<compile_context>
chip_gen: v7x
topology: tpu7x:2x2x1
jax: 0.10.0
libtpu: 0.0.40
codegen_flags: <defaults>
</compile_context>

<pallas_src>
import functools

import jax
import jax.numpy as jnp
from jax.experimental import pallas as pl
from jax.experimental.pallas import tpu as pltpu


_MIN_GRID_STEPS = 4  # keep >= 4 pipeline steps when splitting is possible


def _ste_quant(x, step, inv_step):
    """Exact structural mirror of the PyTorch forward expression."""
    x_q = jnp.round(x * inv_step) * step      # jnp.round == torch.round (half-to-even)
    return x_q + (x - x_q)                    # == x for finite inputs (NaN for inf, like torch)


def _quantized_relu_kernel(x_ref, o_ref, *, step, inv_step):
    o_ref[...] = _ste_quant(x_ref[...], step, inv_step)


def _choose_width(n):
    """Widest lane-dense last dim (multiple of 128) dividing n exactly."""
    for w in (8192, 4096, 2048, 1024, 512, 256, 128):
        if n % w == 0:
            return w
    return 0


def _sublane_tile(itemsize):
    """Native sublane tile for the dtype: (8,128) f32, (16,128) bf16, (32,128) int8."""
    return {4: 8, 2: 16, 1: 32}.get(itemsize, 8)


def _device_tuning():
    """(target block bytes, vmem_limit_bytes or None) per TPU generation."""
    try:
        kind = jax.devices()[0].device_kind.lower()
    except Exception:  # pragma: no cover - defensive fallback
        kind = ""
    if "v7" in kind:
        # 8 MiB blocks -> 32 MiB resident (in+out double-buffered); raise the
        # scoped VMEM limit explicitly (physical VMEM on v7x is 64 MiB).
        return 8 * 1024 * 1024, 48 << 20
    if "v6" in kind:
        # 4 MiB blocks -> 16 MiB resident, fits the 32 MiB scoped default.
        return 4 * 1024 * 1024, None
    # v5e (16 MiB scoped default) and everything else: 2 MiB blocks -> 8 MiB resident.
    return 2 * 1024 * 1024, None


def _run_bulk(bulk, step, inv_step, in_place):
    """Run the Pallas kernel over a 128-aligned 1D slab."""
    n_bulk = bulk.shape[0]
    dtype = bulk.dtype
    itemsize = jnp.dtype(dtype).itemsize

    w = _choose_width(n_bulk)
    rows = n_bulk // w
    sub = _sublane_tile(itemsize)
    block_bytes, vmem_limit = _device_tuning()

    max_block_rows = max(sub, (block_bytes // (w * itemsize)) // sub * sub)
    split_rows = (rows // _MIN_GRID_STEPS) // sub * sub
    if split_rows >= sub:
        # Enough rows to keep >= _MIN_GRID_STEPS pipeline steps alive.
        block_rows = min(max_block_rows, split_rows)
    else:
        # Genuinely tiny input: single (full-extent or sub-aligned) block.
        block_rows = min(rows, max_block_rows)
    grid = (pl.cdiv(rows, block_rows),)

    cp_kwargs = dict(dimension_semantics=("parallel",))
    if vmem_limit is not None:
        cp_kwargs["vmem_limit_bytes"] = vmem_limit

    kernel = functools.partial(_quantized_relu_kernel, step=step, inv_step=inv_step)
    call_kwargs = {}
    if in_place:
        call_kwargs["input_output_aliases"] = {0: 0}

    out2d = pl.pallas_call(
        kernel,
        out_shape=jax.ShapeDtypeStruct((rows, w), dtype),
        grid=grid,
        in_specs=[pl.BlockSpec((block_rows, w), lambda i: (i, 0))],
        out_specs=pl.BlockSpec((block_rows, w), lambda i: (i, 0)),
        compiler_params=pltpu.CompilerParams(**cp_kwargs),
        **call_kwargs,
    )(bulk.reshape(rows, w))
    return out2d.reshape(-1)


@functools.partial(jax.jit, static_argnums=(1, 2))
def _quantized_relu_impl(x, num_bits, in_place):
    step = 2.0 / (2 ** num_bits - 1)
    inv_step = 1.0 / step

    orig_shape = x.shape
    flat = x.reshape(-1)
    n = flat.shape[0]
    n_bulk = (n // 128) * 128

    if n_bulk == 0:
        # Fewer than 128 elements: not worth a kernel launch.
        return _ste_quant(x, step, inv_step)

    if n_bulk == n:
        out_flat = _run_bulk(flat, step, inv_step, in_place)
    else:
        # Ragged tail (< 128 elems): kernel on the aligned bulk, jnp on the rest.
        out_bulk = _run_bulk(flat[:n_bulk], step, inv_step, in_place)
        out_tail = _ste_quant(flat[n_bulk:], step, inv_step)
        out_flat = jnp.concatenate([out_bulk, out_tail])

    return out_flat.reshape(orig_shape)


def quantized_relu(x, num_bits, *, in_place=False):
    """QuantizedReLU forward (straight-through quantizer value) for any shape."""
    return _quantized_relu_impl(x, num_bits, in_place)


def quantized_relu_ref(x, num_bits):
    # Exactly mirrors the PyTorch forward expression (with the divide).
    step = 2.0 / (2 ** num_bits - 1)
    x_q = jnp.round(x / step) * step
    return x_q + (x - x_q)


if __name__ == "__main__":
    num_bits = 4
    key = jax.random.PRNGKey(0)
    k1, k2, k3 = jax.random.split(key, 3)

    # NCHW activations, consistent with the conv-onet decoder context.
    x = jax.random.normal(k1, (2, 4, 16, 16), dtype=jnp.float32)
    out = jax.block_until_ready(quantized_relu(x, num_bits))
    ref = quantized_relu_ref(x, num_bits)
    assert out.shape == x.shape and out.dtype == x.dtype
    assert jnp.allclose(out, ref, atol=1e-6), "mismatch vs reference (NCHW case)"

    # Ragged element count -> aligned-bulk kernel + tiny jnp tail.
    y = jax.random.normal(k2, (3, 300), dtype=jnp.float32)
    out_y = jax.block_until_ready(quantized_relu(y, num_bits))
    assert out_y.shape == y.shape and out_y.dtype == y.dtype
    assert jnp.allclose(out_y, quantized_relu_ref(y, num_bits), atol=1e-6), \
        "mismatch vs reference (ragged case)"

    # Big enough to exercise the multi-step pipelined grid (>= 4 blocks).
    z = jax.random.normal(k3, (32, 64, 128), dtype=jnp.float32)
    out_z = jax.block_until_ready(quantized_relu(z, num_bits))
    assert jnp.allclose(out_z, quantized_relu_ref(z, num_bits), atol=1e-6), \
        "mismatch vs reference (multi-block case)"

    # Tiny (< 128 elements) -> pure-jnp fallback path.
    t = jax.random.normal(k1, (3, 5, 7), dtype=jnp.float32)
    out_t = jax.block_until_ready(quantized_relu(t, num_bits))
    assert jnp.allclose(out_t, quantized_relu_ref(t, num_bits), atol=1e-6), \
        "mismatch vs reference (tiny case)"

    print("KERNEL_OK")
</pallas_src>

<mosaic_0001>
module attributes {stable_mosaic.version = 11 : i64} {
  func.func @_quantized_relu_kernel(%arg0: i32, %arg1: memref<1x2048xf32, #tpu.memory_space<vmem>>, %arg2: memref<1x2048xf32, #tpu.memory_space<vmem>>) attributes {dimension_semantics = [#tpu.dimension_semantics<parallel>], iteration_bounds = array<i64: 1>, scalar_prefetch = 0 : i64, scratch_operands = 0 : i64, tpu.core_type = #tpu.core_type<tc>, window_params = [{transform_indices = @transform_0, window_bounds = array<i64: 1, 2048>}, {transform_indices = @transform_1, window_bounds = array<i64: 1, 2048>}]} {
    %c0 = arith.constant 0 : index
    %c0_0 = arith.constant 0 : index
    %0 = vector.load %arg1[%c0, %c0_0] : memref<1x2048xf32, #tpu.memory_space<vmem>>, vector<1x2048xf32>
    %cst = arith.constant 7.500000e+00 : f32
    %1 = vector.broadcast %cst : f32 to vector<1x2048xf32>
    %2 = arith.mulf %0, %1 : vector<1x2048xf32>
    %3 = math.roundeven %2 : vector<1x2048xf32>
    %cst_1 = arith.constant 0.13333334 : f32
    %4 = vector.broadcast %cst_1 : f32 to vector<1x2048xf32>
    %5 = arith.mulf %3, %4 : vector<1x2048xf32>
    %6 = arith.subf %0, %5 : vector<1x2048xf32>
    %7 = arith.addf %5, %6 : vector<1x2048xf32>
    %c0_2 = arith.constant 0 : index
    %c0_3 = arith.constant 0 : index
    %8 = vector.load %arg2[%c0_2, %c0_3] : memref<1x2048xf32, #tpu.memory_space<vmem>>, vector<1x2048xf32>
    tpu.vector_store %arg2[%c0_2, %c0_3], %7 {strides = array<i32>} : memref<1x2048xf32, #tpu.memory_space<vmem>>, vector<1x2048xf32>,
    return
  }
  func.func @transform_0(%arg0: i32) -> (i32, i32) {
    %c0_i32 = arith.constant 0 : i32
    %c0_i32_0 = arith.constant 0 : i32
    return %arg0, %c0_i32 : i32, i32
  }
  func.func @transform_1(%arg0: i32) -> (i32, i32) {
    %c0_i32 = arith.constant 0 : i32
    %c0_i32_0 = arith.constant 0 : i32
    return %arg0, %c0_i32 : i32, i32
  }
}

</mosaic_0001>

<bundles_post_ra>
// kernel: _quantized_relu_impl.1
= control target key start
LH: loop header
LB: loop body
LE: loop exit
PB: predicated region body
PF: predicated region fallthrough
CT: control target
= control target key end

     0   :  { %s50_s0 = inlined_call_operand.vmem [shape: f32[1,2048], index: 0, kind: input, shape index: {}]   ;;  %s51_s1 = inlined_call_operand.vmem [shape: f32[1,2048], index: 1, kind: output, shape index: {}]  }
   0x1   :  { %v8_v0 = vld [vmem:[%s50_s0] sm:$0xff]  ;;  %v9_v1 = vld [vmem:[%s50_s0 + $0x8] sm:$0xff] }
   0x2   :  { %v10_v2 = vmul.f32 7.5, %v8_v0  ;;  %v11_v3 = vmul.f32 7.5, %v9_v1 }
   0x4   :  { %v26_v4 = vround.rtne.f32 %v10_v2  ;;  %v27_v5 = vround.rtne.f32 %v11_v3 }
   0x6   :  { %v14_v6 = vmul.f32 0.13333334, %v26_v4  ;;  %v15_v7 = vmul.f32 0.13333334, %v27_v5 }
   0x8   :  { %v16_v8 = vsub.f32 %v8_v0, %v14_v6  ;;  %v17_v9 = vsub.f32 %v9_v1, %v15_v7 }
   0xa   :  { %v18_v10 = vadd.f32 %v16_v8, %v14_v6  ;;  %v19_v11 = vadd.f32 %v17_v9, %v15_v7 }
   0xc   :  { %20 = vst [vmem:[%s51_s1] sm:$0xff] %v18_v10  ;;  %21 = vst [vmem:[%s51_s1 + $0x8] sm:$0xff] %v19_v11 }

</bundles_post_ra>
